<compile_context>
chip_gen: v5e
topology: v5e:2x2
jax: 0.10.0
libtpu: 0.0.40
codegen_flags: <defaults>
</compile_context>

<pallas_src>
import functools

import jax
import jax.numpy as jnp
from jax.experimental import pallas as pl
from jax.experimental.pallas import tpu as pltpu


_NEG = -1e30       # drives padded logit columns to zero probability after softmax
_SUBLANE = 16      # bf16 packs (16,128); 16-multiple batch tiles keep stores unmasked
_LANE = 128


def _round_up(n, m):
    return ((n + m - 1) // m) * m


# ---------------------------------------------------------------------------
# Kernel: one fused pass  x -> (W1x+b1, relu) -> (W2h+b2, relu) -> logits -> softmax
# Biases are folded into the matmuls via a constant-1.0 column in x and bias
# rows in the padded weights; padded logit columns carry -1e30 so the in-kernel
# softmax over the padded width is exact for the real bins.
# ---------------------------------------------------------------------------
def bnn_kernel(x_ref, w1_ref, w2_ref, w3_ref, o_ref):
    # x tile: [TB, in_narrow]; weights: [in_narrow, H], [H, H], [H, OUT]  (H, OUT = 128)
    cdt = w1_ref.dtype
    h1 = jnp.dot(x_ref[...], w1_ref[...], preferred_element_type=jnp.float32)
    h1 = jnp.maximum(h1, 0.0)                       # f32 VPU math (v5e has no bf16 VPU)
    h2 = jnp.dot(h1.astype(cdt), w2_ref[...], preferred_element_type=jnp.float32)
    h2 = jnp.maximum(h2, 0.0)
    logits = jnp.dot(h2.astype(cdt), w3_ref[...], preferred_element_type=jnp.float32)

    # softmax over the padded last axis; padded columns ~ -1e30 -> exp == 0
    m = jnp.max(logits, axis=-1, keepdims=True)
    e = jnp.exp(logits - m)
    denom = jnp.sum(e, axis=-1, keepdims=True)
    inv = pl.reciprocal(denom, approx=True)         # EUP slot (nearly free)
    inv = inv * (2.0 - denom * inv)                 # one Newton step -> exact normalization
    o_ref[...] = (e * inv).astype(o_ref.dtype)


def _pick_batch_tile(batch, desired):
    """Batch tile: multiple of 16, sized from B (up to `desired`), and kept at
    >=2 grid steps when the batch allows it (v7x megacore + DMA pipelining)."""
    b_al = _round_up(max(batch, 1), _SUBLANE)
    tb = min(_round_up(desired, _SUBLANE), b_al)
    while tb > _SUBLANE and pl.cdiv(b_al, tb) < 2:
        tb = max(_SUBLANE, _round_up(tb // 2, _SUBLANE))
    return tb


@functools.partial(jax.jit, static_argnames=("num_bins", "desired_tile", "out_dtype"))
def bnn_forward(x, w1, w2, w3, *, num_bins, desired_tile=1024, out_dtype=None):
    """x: [B, input_dim] float32.  w1/w2/w3: padded weights from build_params."""
    B, input_dim = x.shape
    in_narrow = w1.shape[0]
    h_pad = w2.shape[0]
    out_pad = w3.shape[1]
    wdt = w1.dtype
    if out_dtype is None:
        out_dtype = wdt
    assert in_narrow == _round_up(input_dim + 1, _SUBLANE)
    assert w1.shape[1] == h_pad and w2.shape[1] == h_pad and w3.shape[0] == h_pad

    tb = _pick_batch_tile(B, desired_tile)
    B_pad = _round_up(B, tb)

    # Narrow padded x: only the constant-1.0 column (picks up the folded bias
    # rows) plus rounding to the 16-row sublane packing.  Built inside the jit
    # so padding fuses with the kernel launch instead of an extra HBM pass.
    x_pad = jnp.zeros((B_pad, in_narrow), wdt)
    x_pad = x_pad.at[:B, :input_dim].set(x.astype(wdt))
    x_pad = x_pad.at[:, input_dim].set(1.0)

    out = pl.pallas_call(
        bnn_kernel,
        out_shape=jax.ShapeDtypeStruct((B_pad, out_pad), out_dtype),
        grid=(B_pad // tb,),
        in_specs=[
            # x: last dim == full array dim (narrow), rows tiled over the grid.
            pl.BlockSpec((tb, in_narrow), lambda i: (i, 0)),
            # Constant index_maps: weights fetched once, VMEM-resident across steps.
            pl.BlockSpec((in_narrow, h_pad), lambda i: (0, 0)),
            pl.BlockSpec((h_pad, h_pad), lambda i: (0, 0)),
            pl.BlockSpec((h_pad, out_pad), lambda i: (0, 0)),
        ],
        out_specs=pl.BlockSpec((tb, out_pad), lambda i: (i, 0)),
        # VMEM footprint: < 3 MiB even at tb=2048 -> no vmem_limit override needed
        # on any of v5e / v6e / v7x.
        compiler_params=pltpu.CompilerParams(
            dimension_semantics=("parallel",),      # megacore sharding on v7x
        ),
    )(x_pad, w1, w2, w3)

    return out[:B, :num_bins]


# ---------------------------------------------------------------------------
# Parameter construction (torchbnn-style sampled BayesLinear, packed/padded)
# ---------------------------------------------------------------------------
def make_bayes_linear_params(key, in_features, out_features,
                             prior_mu=0.0, prior_sigma=0.1):
    """torchbnn-style sampled BayesLinear: W = mu + exp(log_sigma) * eps, with
    mu ~ U(-1/sqrt(in), 1/sqrt(in)) and log_sigma = log(prior_sigma).
    Returns (W as [in, out], b as [out])."""
    k_mu_w, k_eps_w, k_mu_b, k_eps_b = jax.random.split(key, 4)
    bound = 1.0 / jnp.sqrt(jnp.float32(in_features))

    w_mu = jax.random.uniform(k_mu_w, (out_features, in_features),
                              jnp.float32, -bound, bound)
    w_eps = jax.random.normal(k_eps_w, (out_features, in_features), jnp.float32)
    w = w_mu + prior_sigma * w_eps  # exp(log(prior_sigma)) == prior_sigma

    b_mu = jax.random.uniform(k_mu_b, (out_features,), jnp.float32, -bound, bound)
    b_eps = jax.random.normal(k_eps_b, (out_features,), jnp.float32)
    b = b_mu + prior_sigma * b_eps
    return w.T, b


def _pack_layer(w_io, b, in_pad, out_pad, *, ones_col=None, mask_tail=False):
    """Pack a [in,out] weight + [out] bias into a padded [in_pad,out_pad] matrix.
    Bias goes into row `in` (picked up by the input's constant-1.0 column);
    `ones_col` propagates the 1.0 column to the output; `mask_tail` pushes
    padded logit columns to -1e30."""
    in_dim, out_dim = w_io.shape
    W = jnp.zeros((in_pad, out_pad), jnp.float32)
    W = W.at[:in_dim, :out_dim].set(w_io)
    W = W.at[in_dim, :out_dim].set(b)
    if ones_col is not None:
        W = W.at[in_dim, ones_col].set(1.0)
    if mask_tail and out_dim < out_pad:
        W = W.at[in_dim, out_dim:].set(_NEG)   # fine for f32/bf16; NOT fp8-safe
    return W


def build_params(key, input_dim, num_bins, hidden_dim, *, dtype=jnp.bfloat16):
    k1, k2, k3 = jax.random.split(key, 3)
    w1, b1 = make_bayes_linear_params(k1, input_dim, hidden_dim)
    w2, b2 = make_bayes_linear_params(k2, hidden_dim, hidden_dim)
    w3, b3 = make_bayes_linear_params(k3, hidden_dim, num_bins)

    in_narrow = _round_up(input_dim + 1, _SUBLANE)   # +1: constant-ones column (narrow!)
    h_pad = _round_up(hidden_dim + 1, _LANE)         # lane-dense hidden width
    out_pad = _round_up(num_bins, _LANE)             # lane-dense output store

    packed = {
        "w1": _pack_layer(w1, b1, in_narrow, h_pad, ones_col=hidden_dim).astype(dtype),
        "w2": _pack_layer(w2, b2, h_pad, h_pad, ones_col=hidden_dim).astype(dtype),
        "w3": _pack_layer(w3, b3, h_pad, out_pad, mask_tail=True).astype(dtype),
        "num_bins": num_bins,
    }
    raw = {"w1": w1, "b1": b1, "w2": w2, "b2": b2, "w3": w3, "b3": b3}
    return packed, raw


if __name__ == "__main__":
    key = jax.random.PRNGKey(0)
    k_params, k_x = jax.random.split(key)

    # Small shapes consistent with the module (hidden_dim matches the nn.Module default).
    B, input_dim, hidden_dim, num_bins = 256, 16, 64, 8

    x = jax.random.normal(k_x, (B, input_dim), jnp.float32)

    # Plain-JAX reference (unpadded, f32) from the same sampled weights.
    packed_bf16, raw = build_params(k_params, input_dim, num_bins, hidden_dim,
                                    dtype=jnp.bfloat16)
    h1 = jnp.maximum(x @ raw["w1"] + raw["b1"], 0.0)
    h2 = jnp.maximum(h1 @ raw["w2"] + raw["b2"], 0.0)
    ref = jax.nn.softmax(h2 @ raw["w3"] + raw["b3"], axis=-1)

    # Default path: bf16 streaming + bf16 output (f32 accumulation in-kernel).
    out_bf16 = jax.block_until_ready(
        bnn_forward(x, packed_bf16["w1"], packed_bf16["w2"], packed_bf16["w3"],
                    num_bins=num_bins))
    assert out_bf16.shape == (B, num_bins)
    assert out_bf16.dtype == jnp.bfloat16
    out_bf16_f32 = out_bf16.astype(jnp.float32)
    assert bool(jnp.all(jnp.abs(jnp.sum(out_bf16_f32, axis=-1) - 1.0) < 2e-2))
    assert bool(jnp.all(jnp.abs(out_bf16_f32 - ref) < 3e-2))

    # f32 path (tighter parity check against the reference).
    packed_f32, _ = build_params(k_params, input_dim, num_bins, hidden_dim,
                                 dtype=jnp.float32)
    out_f32 = jax.block_until_ready(
        bnn_forward(x, packed_f32["w1"], packed_f32["w2"], packed_f32["w3"],
                    num_bins=num_bins, out_dtype=jnp.float32))
    assert out_f32.shape == (B, num_bins)
    assert out_f32.dtype == jnp.float32
    assert bool(jnp.all(jnp.abs(jnp.sum(out_f32, axis=-1) - 1.0) < 1e-3))
    assert bool(jnp.all(jnp.abs(out_f32 - ref) < 2e-3))

    print("KERNEL_OK")
</pallas_src>

<mosaic_0001>
module attributes {stable_mosaic.version = 11 : i64} {
  func.func @bnn_kernel(%arg0: i32, %arg1: memref<128x32xbf16, #tpu.memory_space<vmem>>, %arg2: memref<32x128xbf16, #tpu.memory_space<vmem>>, %arg3: memref<128x128xbf16, #tpu.memory_space<vmem>>, %arg4: memref<128x128xbf16, #tpu.memory_space<vmem>>, %arg5: memref<128x128xbf16, #tpu.memory_space<vmem>>) attributes {dimension_semantics = [#tpu.dimension_semantics<parallel>], iteration_bounds = array<i64: 2>, scalar_prefetch = 0 : i64, scratch_operands = 0 : i64, tpu.core_type = #tpu.core_type<tc>, window_params = [{transform_indices = @transform_0, window_bounds = array<i64: 128, 32>}, {pipeline_mode = #tpu.pipeline_mode<synchronous>, transform_indices = @transform_1, window_bounds = array<i64: 32, 128>}, {pipeline_mode = #tpu.pipeline_mode<synchronous>, transform_indices = @transform_2, window_bounds = array<i64: 128, 128>}, {pipeline_mode = #tpu.pipeline_mode<synchronous>, transform_indices = @transform_3, window_bounds = array<i64: 128, 128>}, {transform_indices = @transform_4, window_bounds = array<i64: 128, 128>}]} {
    %c0 = arith.constant 0 : index
    %c0_0 = arith.constant 0 : index
    %0 = vector.load %arg1[%c0, %c0_0] : memref<128x32xbf16, #tpu.memory_space<vmem>>, vector<128x32xbf16>
    %c0_1 = arith.constant 0 : index
    %c0_2 = arith.constant 0 : index
    %1 = vector.load %arg2[%c0_1, %c0_2] : memref<32x128xbf16, #tpu.memory_space<vmem>>, vector<32x128xbf16>
    %cst = arith.constant dense<0.000000e+00> : vector<128x128xf32>
    %2 = tpu.matmul %0, %1, %cst {dimension_numbers = #tpu.dot_dimension_numbers<[1], [0], [0], [1], [0, 0, 1, 1], [], []>} : vector<128x32xbf16>, vector<32x128xbf16>, vector<128x128xf32> -> vector<128x128xf32>
    %cst_3 = arith.constant 0.000000e+00 : f32
    %3 = vector.broadcast %cst_3 : f32 to vector<128x128xf32>
    %4 = arith.maximumf %2, %3 : vector<128x128xf32>
    %5 = arith.truncf %4 : vector<128x128xf32> to vector<128x128xbf16>
    %c0_4 = arith.constant 0 : index
    %c0_5 = arith.constant 0 : index
    %6 = vector.load %arg3[%c0_4, %c0_5] : memref<128x128xbf16, #tpu.memory_space<vmem>>, vector<128x128xbf16>
    %cst_6 = arith.constant dense<0.000000e+00> : vector<128x128xf32>
    %7 = tpu.matmul %5, %6, %cst_6 {dimension_numbers = #tpu.dot_dimension_numbers<[1], [0], [0], [1], [0, 0, 1, 1], [], []>} : vector<128x128xbf16>, vector<128x128xbf16>, vector<128x128xf32> -> vector<128x128xf32>
    %cst_7 = arith.constant 0.000000e+00 : f32
    %8 = vector.broadcast %cst_7 : f32 to vector<128x128xf32>
    %9 = arith.maximumf %7, %8 : vector<128x128xf32>
    %10 = arith.truncf %9 : vector<128x128xf32> to vector<128x128xbf16>
    %c0_8 = arith.constant 0 : index
    %c0_9 = arith.constant 0 : index
    %11 = vector.load %arg4[%c0_8, %c0_9] : memref<128x128xbf16, #tpu.memory_space<vmem>>, vector<128x128xbf16>
    %cst_10 = arith.constant dense<0.000000e+00> : vector<128x128xf32>
    %12 = tpu.matmul %10, %11, %cst_10 {dimension_numbers = #tpu.dot_dimension_numbers<[1], [0], [0], [1], [0, 0, 1, 1], [], []>} : vector<128x128xbf16>, vector<128x128xbf16>, vector<128x128xf32> -> vector<128x128xf32>
    %cst_11 = arith.constant dense<0xFF800000> : vector<128xf32>
    %13 = vector.multi_reduction <maximumf>, %12, %cst_11 [1] : vector<128x128xf32> to vector<128xf32>
    %14 = vector.shape_cast %13 : vector<128xf32> to vector<128x1xf32>
    %15 = vector.broadcast %14 : vector<128x1xf32> to vector<128x128xf32>
    %16 = arith.subf %12, %15 : vector<128x128xf32>
    %17 = math.exp %16 : vector<128x128xf32>
    %cst_12 = arith.constant dense<0.000000e+00> : vector<128xf32>
    %18 = vector.multi_reduction <add>, %17, %cst_12 [1] : vector<128x128xf32> to vector<128xf32>
    %19 = vector.shape_cast %18 : vector<128xf32> to vector<128x1xf32>
    %20 = tpu.reciprocal %19 {approx = true} : vector<128x1xf32> -> vector<128x1xf32>
    %21 = arith.mulf %19, %20 : vector<128x1xf32>
    %cst_13 = arith.constant 2.000000e+00 : f32
    %22 = vector.broadcast %cst_13 : f32 to vector<128x1xf32>
    %23 = arith.subf %22, %21 : vector<128x1xf32>
    %24 = arith.mulf %20, %23 : vector<128x1xf32>
    %25 = vector.broadcast %24 : vector<128x1xf32> to vector<128x128xf32>
    %26 = arith.mulf %17, %25 : vector<128x128xf32>
    %27 = arith.truncf %26 : vector<128x128xf32> to vector<128x128xbf16>
    %c0_14 = arith.constant 0 : index
    %c0_15 = arith.constant 0 : index
    %28 = vector.load %arg5[%c0_14, %c0_15] : memref<128x128xbf16, #tpu.memory_space<vmem>>, vector<128x128xbf16>
    tpu.vector_store %arg5[%c0_14, %c0_15], %27 {strides = array<i32>} : memref<128x128xbf16, #tpu.memory_space<vmem>>, vector<128x128xbf16>,
    return
  }
  func.func @transform_0(%arg0: i32) -> (i32, i32) {
    %c0_i32 = arith.constant 0 : i32
    %c0_i32_0 = arith.constant 0 : i32
    return %arg0, %c0_i32 : i32, i32
  }
  func.func @transform_1(%arg0: i32) -> (i32, i32) {
    %c0_i32 = arith.constant 0 : i32
    %c0_i32_0 = arith.constant 0 : i32
    %c0_i32_1 = arith.constant 0 : i32
    return %c0_i32, %c0_i32_0 : i32, i32
  }
  func.func @transform_2(%arg0: i32) -> (i32, i32) {
    %c0_i32 = arith.constant 0 : i32
    %c0_i32_0 = arith.constant 0 : i32
    %c0_i32_1 = arith.constant 0 : i32
    return %c0_i32, %c0_i32_0 : i32, i32
  }
  func.func @transform_3(%arg0: i32) -> (i32, i32) {
    %c0_i32 = arith.constant 0 : i32
    %c0_i32_0 = arith.constant 0 : i32
    %c0_i32_1 = arith.constant 0 : i32
    return %c0_i32, %c0_i32_0 : i32, i32
  }
  func.func @transform_4(%arg0: i32) -> (i32, i32) {
    %c0_i32 = arith.constant 0 : i32
    %c0_i32_0 = arith.constant 0 : i32
    return %arg0, %c0_i32 : i32, i32
  }
}

</mosaic_0001>

<bundles_post_ra>
// kernel: bnn_forward.1
= control target key start
LH: loop header
LB: loop body
LE: loop exit
PB: predicated region body
PF: predicated region fallthrough
CT: control target
= control target key end

     0   :  { %s1219_s15 = smov 0   ;;  %s1421_s0 = inlined_call_operand.vmem [shape: bf16[256,32], index: 0, kind: input, shape index: {}]   ;;  %s1422_s1 = inlined_call_operand.vmem [shape: bf16[32,128], index: 1, kind: input, shape index: {}]   ;;  %s1423_s2 = inlined_call_operand.vmem [shape: bf16[128,128], index: 2, kind: input, shape index: {}]   ;;  %s1424_s3 = inlined_call_operand.vmem [shape: bf16[128,128], index: 3, kind: input, shape index: {}]   ;;  %s1425_s4 = inlined_call_operand.vmem [shape: bf16[256,128], index: 4, kind: output, shape index: {}]  }
   0x1 LB: > { %s902_s16 = sadd.s32 4294967295, %s1192_s15   ;;  %p906_p0 = scmp.ge.s32.totalorder %s1192_s15, 1  ;;  %s1192_s15 = sphi %s1219_s15, %s14_s15  }
   0x2   : > { %p163_p1 = scmp.lt.s32.totalorder %s1192_s15, 3 }
   0x4   : > { %p164_p2 = pnand %p906_p0, %p163_p1 }
   0x5   : > { %s907_s19 = sshll.u32 (!%p164_p2), %s902_s16, 4 }
   0x6   : > { %167 = sbr.rel (%p164_p2) target bundleno = 814 (0x32e), region = 36  ;;  %p190_p3 = scmp.lt.s32.totalorder (!%p164_p2), %s907_s19, 31 }
   0xb   : > { %v1034_v0 = vld [vmem:[%s1422_s1 + $0x8] sm:$0xff]  ;;  %v1033_v1 = vld [vmem:[%s1422_s1] sm:$0xff]  ;;  %s1427_s19 = smov (!%p190_p3, %s907_s19), 31  ;;  %vm274_vm0 = vcmask 261120   ;;  %v1042_v7 = vld [vmem:[%s1423_s2 + $0x38] sm:$0xff] }
   0xc   : > { %305 = vmatpush.bf16.msra.mxu0 %v1034_v0  ;;  %s908_s22 = sshll.u32 %s1427_s19, 2  ;;  %436 = vmatpush.bf16.msra.mxu1 %v1042_v7  ;;  %v1041_v8 = vld [vmem:[%s1423_s2 + $0x30] sm:$0xff]  ;;  %v1040_v10 = vld [vmem:[%s1423_s2 + $0x28] sm:$0xff]  ;;  %v1039_v11 = vld [vmem:[%s1423_s2 + $0x20] sm:$0xff] }
   0xd   : > { %s1241_s25 = scalar_lea.vmem %s1421_s0, %s908_s22  ;;  %1098 = vmatpush.bf16.msra.mxu3 %v1042_v7  ;;  %v1038_v12 = vld [vmem:[%s1423_s2 + $0x18] sm:$0xff]  ;;  %v1037_v14 = vld [vmem:[%s1423_s2 + $0x10] sm:$0xff]  ;;  %v1036_v15 = vld [vmem:[%s1423_s2 + $0x8] sm:$0xff]  ;;  %s1394_s11 = scalar_lea.vmem %s1425_s4, %s908_s22 }
   0xe   : > { %v1025_v2 = vld [vmem:[%s1241_s25] sm:$0xff]  ;;  %v1026_v3 = vld [vmem:[%s1241_s25 + $0x8] sm:$0xff]  ;;  %v1027_v4 = vld [vmem:[%s1241_s25 + $0x10] sm:$0xff] }
   0xf   : > { %v1028_v5 = vld [vmem:[%s1241_s25 + $0x18] sm:$0xff]  ;;  %v1029_v6 = vld [vmem:[%s1241_s25 + $0x20] sm:$0xff]  ;;  %v1030_v9 = vld [vmem:[%s1241_s25 + $0x28] sm:$0xff] }
  0x10   : > { %306 = vmatpush.bf16.msra.mxu0 %v1033_v1  ;;  %437 = vmatpush.bf16.msra.mxu1 %v1041_v8  ;;  %v1031_v13 = vld [vmem:[%s1241_s25 + $0x30] sm:$0xff]  ;;  %v1035_v16 = vld [vmem:[%s1423_s2] sm:$0xff]  ;;  %v1032_v17 = vld [vmem:[%s1241_s25 + $0x38] sm:$0xff] }
  0x11   : > { %1099 = vmatpush.bf16.msra.mxu3 %v1041_v8  ;;  %v1050_v44 = vld [vmem:[%s1424_s3 + $0x38] sm:$0xff]  ;;  %v1049_v48 = vld [vmem:[%s1424_s3 + $0x30] sm:$0xff]  ;;  %v1048_v50 = vld [vmem:[%s1424_s3 + $0x28] sm:$0xff] }
  0x12   : > { %573 = vmatpush.bf16.msra.mxu2 %v1050_v44  ;;  %v1047_v52 = vld [vmem:[%s1424_s3 + $0x20] sm:$0xff]  ;;  %v1046_v53 = vld [vmem:[%s1424_s3 + $0x18] sm:$0xff]  ;;  %v1045_v57 = vld [vmem:[%s1424_s3 + $0x10] sm:$0xff] }
  0x13   : > { %951 = vmatmul.msk.bf16.vlgmr.msra.gmra.mxu0 %vm274_vm0, %v1025_v2  ;;  %v1044_v59 = vld [vmem:[%s1424_s3 + $0x8] sm:$0xff]  ;;  %v1043_v61 = vld [vmem:[%s1424_s3] sm:$0xff] }
  0x14   : > { %438 = vmatpush.bf16.msra.mxu1 %v1040_v10 }
  0x15   : > { %1100 = vmatpush.bf16.msra.mxu3 %v1040_v10 }
  0x16   : > { %574 = vmatpush.bf16.msra.mxu2 %v1049_v48 }
  0x18   : > { %439 = vmatpush.bf16.msra.mxu1 %v1039_v11 }
  0x19   : > { %1101 = vmatpush.bf16.msra.mxu3 %v1039_v11 }
  0x1a   : > { %575 = vmatpush.bf16.msra.mxu2 %v1048_v50 }
  0x1c   : > { %440 = vmatpush.bf16.msra.mxu1 %v1038_v12 }
  0x1d   : > { %1102 = vmatpush.bf16.msra.mxu3 %v1038_v12 }
  0x1e   : > { %576 = vmatpush.bf16.msra.mxu2 %v1047_v52 }
  0x20   : > { %441 = vmatpush.bf16.msra.mxu1 %v1037_v14 }
  0x21   : > { %1103 = vmatpush.bf16.msra.mxu3 %v1037_v14 }
  0x22   : > { %577 = vmatpush.bf16.msra.mxu2 %v1046_v53 }
  0x23   : > { %952 = vmatmul.msk.bf16.gmra.mxu0 %vm274_vm0, %v1026_v3 }
  0x24   : > { %442 = vmatpush.bf16.msra.mxu1 %v1036_v15 }
  0x25   : > { %1104 = vmatpush.bf16.msra.mxu3 %v1036_v15 }
  0x26   : > { %578 = vmatpush.bf16.msra.mxu2 %v1045_v57 }
  0x28   : > { %443 = vmatpush.bf16.msra.mxu1 %v1035_v16 }
  0x29   : > { %1105 = vmatpush.bf16.msra.mxu3 %v1035_v16 }
  0x2a   : > { %579 = vmatpush.bf16.msra.mxu2 %v1044_v59 }
  0x2d   : > { %1106 = vmatpush.bf16.msrb.mxu3 %v1050_v44 }
  0x2e   : > { %580 = vmatpush.bf16.msra.mxu2 %v1043_v61 }
  0x31   : > { %1107 = vmatpush.bf16.msrb.mxu3 %v1049_v48 }
  0x33   : > { %953 = vmatmul.msk.bf16.gmra.mxu0 %vm274_vm0, %v1027_v4 }
  0x35   : > { %1108 = vmatpush.bf16.msrb.mxu3 %v1048_v50 }
  0x39   : > { %1109 = vmatpush.bf16.msrb.mxu3 %v1047_v52 }
  0x3d   : > { %1110 = vmatpush.bf16.msrb.mxu3 %v1046_v53 }
  0x41   : > { %1111 = vmatpush.bf16.msrb.mxu3 %v1045_v57 }
  0x43   : > { %954 = vmatmul.msk.bf16.gmra.mxu0 %vm274_vm0, %v1028_v5 }
  0x45   : > { %1112 = vmatpush.bf16.msrb.mxu3 %v1044_v59 }
  0x49   : > { %1113 = vmatpush.bf16.msrb.mxu3 %v1043_v61 }
  0x53   : > { %955 = vmatmul.msk.bf16.gmra.mxu0 %vm274_vm0, %v1029_v6 }
  0x63   : > { %956 = vmatmul.msk.bf16.gmra.mxu0 %vm274_vm0, %v1030_v9 }
  0x73   : > { %957 = vmatmul.msk.bf16.gmra.mxu0 %vm274_vm0, %v1031_v13 }
  0x83   : > { %958 = vmatmul.msk.bf16.gmra.mxu0 %vm274_vm0, %v1032_v17 }
  0x90   : > { %v308_v18 = vpop.f32.mrf.mxu0 }
  0x91   : > { %v348_v20 = vmax.f32 %v308_v18, 0.0 }
  0x98   : > { %v310_v19 = vpop.f32.mrf.mxu0 }
  0x99   : > { %v349_v21 = vmax.f32 %v310_v19, 0.0 }
  0x9b   : > { %v364_v22 = vpack.c.bf16 %v349_v21, %v348_v20 }
  0x9d   : > { %444 = vmatmul.bf16.vlgmr.msra.gmra.mxu1 %v364_v22 }
  0xa0   : > { %v313_v23 = vpop.f32.mrf.mxu0 }
  0xa1   : > { %v350_v25 = vmax.f32 %v313_v23, 0.0 }
  0xa8   : > { %v315_v24 = vpop.f32.mrf.mxu0 }
  0xa9   : > { %v351_v26 = vmax.f32 %v315_v24, 0.0 }
  0xab   : > { %v365_v27 = vpack.c.bf16 %v351_v26, %v350_v25 }
  0xad   : > { %449 = vmatmul.bf16.gmra.mxu1 %v365_v27 }
  0xb0   : > { %v318_v28 = vpop.f32.mrf.mxu0 }
  0xb1   : > { %v352_v30 = vmax.f32 %v318_v28, 0.0 }
  0xb8   : > { %v320_v29 = vpop.f32.mrf.mxu0 }
  0xb9   : > { %v353_v31 = vmax.f32 %v320_v29, 0.0 }
  0xbb   : > { %v366_v32 = vpack.c.bf16 %v353_v31, %v352_v30 }
  0xbd   : > { %454 = vmatmul.bf16.gmra.mxu1 %v366_v32 }
  0xc0   : > { %v323_v33 = vpop.f32.mrf.mxu0 }
  0xc1   : > { %v354_v35 = vmax.f32 %v323_v33, 0.0 }
  0xc8   : > { %v325_v34 = vpop.f32.mrf.mxu0 }
  0xc9   : > { %v355_v36 = vmax.f32 %v325_v34, 0.0 }
  0xcb   : > { %v367_v37 = vpack.c.bf16 %v355_v36, %v354_v35 }
  0xcd   : > { %459 = vmatmul.bf16.gmra.mxu1 %v367_v37 }
  0xd0   : > { %v328_v38 = vpop.f32.mrf.mxu0 }
  0xd1   : > { %v356_v40 = vmax.f32 %v328_v38, 0.0 }
  0xd8   : > { %v330_v39 = vpop.f32.mrf.mxu0 }
  0xd9   : > { %v357_v41 = vmax.f32 %v330_v39, 0.0 }
  0xdb   : > { %v368_v42 = vpack.c.bf16 %v357_v41, %v356_v40 }
  0xdd   : > { %464 = vmatmul.bf16.gmra.mxu1 %v368_v42 }
  0xe0   : > { %v333_v43 = vpop.f32.mrf.mxu0 }
  0xe1   : > { %v358_v46 = vmax.f32 %v333_v43, 0.0 }
  0xe8   : > { %v335_v45 = vpop.f32.mrf.mxu0 }
  0xe9   : > { %v359_v47 = vmax.f32 %v335_v45, 0.0 }
  0xeb   : > { %v369_v49 = vpack.c.bf16 %v359_v47, %v358_v46 }
  0xed   : > { %469 = vmatmul.bf16.gmra.mxu1 %v369_v49 }
  0xf0   : > { %v338_v51 = vpop.f32.mrf.mxu0 }
  0xf1   : > { %v360_v55 = vmax.f32 %v338_v51, 0.0 }
  0xf8   : > { %v340_v54 = vpop.f32.mrf.mxu0 }
  0xf9   : > { %v361_v56 = vmax.f32 %v340_v54, 0.0 }
  0xfb   : > { %v370_v58 = vpack.c.bf16 %v361_v56, %v360_v55 }
  0xfd   : > { %474 = vmatmul.bf16.vlgmr.msra.gmra.mxu3 %v370_v58 }
 0x100   : > { %v343_v60 = vpop.f32.mrf.mxu0 }
 0x101   : > { %v362_v63 = vmax.f32 %v343_v60, 0.0 }
 0x108   : > { %v345_v62 = vpop.f32.mrf.mxu0 }
 0x109   : > { %v363_v0 = vmax.f32 %v345_v62, 0.0 }
 0x10b   : > { %v371_v1 = vpack.c.bf16 %v363_v0, %v362_v63 }
 0x10d   : > { %479 = vmatmul.bf16.gmra.mxu3 %v371_v1 }
 0x11a   : > { %v445_v2 = vpop.f32.mrf.mxu1 }
 0x11b   : > { %v485_v4 = vmax.f32 %v445_v2, 0.0 }
 0x122   : > { %v447_v3 = vpop.f32.mrf.mxu1 }
 0x123   : > { %v486_v5 = vmax.f32 %v447_v3, 0.0 }
 0x125   : > { %v501_v6 = vpack.c.bf16 %v486_v5, %v485_v4 }
 0x127   : > { %581 = vmatmul.bf16.vlgmr.msra.gmra.mxu2 %v501_v6 }
 0x12a   : > { %v450_v7 = vpop.f32.mrf.mxu1 }
 0x12b   : > { %v487_v9 = vmax.f32 %v450_v7, 0.0 }
 0x132   : > { %v452_v8 = vpop.f32.mrf.mxu1 }
 0x133   : > { %v488_v10 = vmax.f32 %v452_v8, 0.0 }
 0x135   : > { %v502_v11 = vpack.c.bf16 %v488_v10, %v487_v9 }
 0x137   : > { %586 = vmatmul.bf16.gmra.mxu2 %v502_v11 }
 0x13a   : > { %v455_v12 = vpop.f32.mrf.mxu1 }
 0x13b   : > { %v489_v14 = vmax.f32 %v455_v12, 0.0 }
 0x142   : > { %v457_v13 = vpop.f32.mrf.mxu1 }
 0x143   : > { %v490_v15 = vmax.f32 %v457_v13, 0.0 }
 0x145   : > { %v503_v16 = vpack.c.bf16 %v490_v15, %v489_v14 }
 0x147   : > { %591 = vmatmul.bf16.gmra.mxu2 %v503_v16 }
 0x14a   : > { %v460_v17 = vpop.f32.mrf.mxu1 }
 0x14b   : > { %v491_v19 = vmax.f32 %v460_v17, 0.0 }
 0x152   : > { %v462_v18 = vpop.f32.mrf.mxu1 }
 0x153   : > { %v492_v20 = vmax.f32 %v462_v18, 0.0 }
 0x155   : > { %v504_v21 = vpack.c.bf16 %v492_v20, %v491_v19 }
 0x157   : > { %596 = vmatmul.bf16.gmra.mxu2 %v504_v21 }
 0x15a   : > { %v465_v22 = vpop.f32.mrf.mxu1 }
 0x15b   : > { %v493_v24 = vmax.f32 %v465_v22, 0.0 }
 0x162   : > { %v467_v23 = vpop.f32.mrf.mxu1 }
 0x163   : > { %v494_v25 = vmax.f32 %v467_v23, 0.0 }
 0x165   : > { %v505_v26 = vpack.c.bf16 %v494_v25, %v493_v24 }
 0x167   : > { %601 = vmatmul.bf16.gmra.mxu2 %v505_v26 }
 0x16a   : > { %v470_v27 = vpop.f32.mrf.mxu1 }
 0x16b   : > { %v495_v29 = vmax.f32 %v470_v27, 0.0 }
 0x172   : > { %v472_v28 = vpop.f32.mrf.mxu1 }
 0x173   : > { %v496_v30 = vmax.f32 %v472_v28, 0.0 }
 0x175   : > { %v506_v31 = vpack.c.bf16 %v496_v30, %v495_v29 }
 0x177   : > { %606 = vmatmul.bf16.gmra.mxu2 %v506_v31 }
 0x180   : > { %v475_v32 = vpop.f32.mrf.mxu3 }
 0x181   : > { %v497_v34 = vmax.f32 %v475_v32, 0.0 }
 0x188   : > { %v477_v33 = vpop.f32.mrf.mxu3 }
 0x189   : > { %v498_v35 = vmax.f32 %v477_v33, 0.0 }
 0x18b   : > { %v507_v36 = vpack.c.bf16 %v498_v35, %v497_v34 }
 0x18d   : > { %611 = vmatmul.bf16.vlgmr.msrb.gmra.mxu3 %v507_v36 }
 0x190   : > { %v480_v37 = vpop.f32.mrf.mxu3 }
 0x191   : > { %v499_v39 = vmax.f32 %v480_v37, 0.0 }
 0x198   : > { %v482_v38 = vpop.f32.mrf.mxu3 }
 0x199   : > { %v500_v40 = vmax.f32 %v482_v38, 0.0 }
 0x19b   : > { %v508_v41 = vpack.c.bf16 %v500_v40, %v499_v39 }
 0x19d   : > { %616 = vmatmul.bf16.gmra.mxu3 %v508_v41 }
 0x1aa   : > { %v582_v42 = vpop.f32.mrf.mxu2 }
 0x1ab   : > { %622 = vmax.xlane.f32.xlu0 %v582_v42 }
 0x1b2   : > { %v584_v43 = vpop.f32.mrf.mxu2 }
 0x1b3   : > { %624 = vmax.xlane.f32.xlu0 %v584_v43 }
 0x1ba   : > { %v587_v44 = vpop.f32.mrf.mxu2 }
 0x1bb   : > { %626 = vmax.xlane.f32.xlu1 %v587_v44 }
 0x1c2   : > { %v589_v45 = vpop.f32.mrf.mxu2 }
 0x1c3   : > { %628 = vmax.xlane.f32.xlu1 %v589_v45 }
 0x1ca   : > { %v592_v46 = vpop.f32.mrf.mxu2 }
 0x1cb   : > { %630 = vmax.xlane.f32.xlu2 %v592_v46 }
 0x1d2   : > { %v594_v47 = vpop.f32.mrf.mxu2 }
 0x1d3   : > { %632 = vmax.xlane.f32.xlu2 %v594_v47 }
 0x1da   : > { %v597_v48 = vpop.f32.mrf.mxu2 }
 0x1db   : > { %634 = vmax.xlane.f32.xlu0 %v597_v48 }
 0x1e2   : > { %v599_v49 = vpop.f32.mrf.mxu2 }
 0x1e3   : > { %636 = vmax.xlane.f32.xlu1 %v599_v49 }
 0x1ea   : > { %v1307_v50 = vpop.f32.mrf.mxu2 }
 0x1eb   : > { %638 = vmax.xlane.f32.xlu2 %v1307_v50 }
 0x1f2   : > { %v1310_v51 = vpop.f32.mrf.mxu2 }
 0x1f3   : > { %640 = vmax.xlane.f32.xlu0 %v1310_v51 }
 0x1fa   : > { %v1313_v52 = vpop.f32.mrf.mxu2 }
 0x1fb   : > { %642 = vmax.xlane.f32.xlu1 %v1313_v52 }
 0x202   : > { %v1316_v53 = vpop.f32.mrf.mxu2 }
 0x203   : > { %644 = vmax.xlane.f32.xlu2 %v1316_v53 }
 0x210   : > { %v1319_v54 = vpop.f32.mrf.mxu3 }
 0x211   : > { %646 = vmax.xlane.f32.xlu0 %v1319_v54 }
 0x218   : > { %v1322_v55 = vpop.f32.mrf.mxu3 }
 0x219   : > { %648 = vmax.xlane.f32.xlu1 %v1322_v55 }
 0x21e   : > { %v623_v56 = vpop.xlane.xlu0 %622 }
 0x21f   : > { %v654_v57 = vsub.f32 %v582_v42, %v623_v56 }
 0x220   : > { %v1325_v58 = vpop.f32.mrf.mxu3 }
 0x221   : > { %v670_v59 = vmul.f32 1.442695, %v654_v57  ;;  %650 = vmax.xlane.f32.xlu2 %v1325_v58 }
 0x223   : > { %1122 = vpow2.f32 %v670_v59 }
 0x226   : > { %v625_v60 = vpop.xlane.xlu0 %624 }
 0x227   : > { %v655_v61 = vsub.f32 %v584_v43, %v625_v60 }
 0x228   : > { %v1328_v62 = vpop.f32.mrf.mxu3 }
 0x229   : > { %v1330_v63 = vpop.eup %1122  ;;  %v672_v0 = vmul.f32 1.442695, %v655_v61  ;;  %652 = vmax.xlane.f32.xlu0 %v1328_v62 }
 0x22a   : > { %702 = vadd.xlane.f32.xlu1 %v1330_v63 }
 0x22b   : > { %1124 = vpow2.f32 %v672_v0 }
 0x22e   : > { %v627_v1 = vpop.xlane.xlu1 %626 }
 0x22f   : > { %v656_v2 = vsub.f32 %v587_v44, %v627_v1 }
 0x231   : > { %v1334_v3 = vpop.eup %1124  ;;  %v674_v4 = vmul.f32 1.442695, %v656_v2 }
 0x232   : > { %704 = vadd.xlane.f32.xlu2 %v1334_v3 }
 0x233   : > { %1126 = vpow2.f32 %v674_v4 }
 0x236   : > { %v629_v5 = vpop.xlane.xlu1 %628 }
 0x237   : > { %v657_v6 = vsub.f32 %v589_v45, %v629_v5 }
 0x239   : > { %v1337_v7 = vpop.eup %1126  ;;  %v676_v8 = vmul.f32 1.442695, %v657_v6 }
 0x23a   : > { %706 = vadd.xlane.f32.xlu0 %v1337_v7 }
 0x23b   : > { %1128 = vpow2.f32 %v676_v8 }
 0x23e   : > { %v631_v9 = vpop.xlane.xlu2 %630 }
 0x23f   : > { %v658_v10 = vsub.f32 %v592_v46, %v631_v9 }
 0x241   : > { %v1340_v11 = vpop.eup %1128  ;;  %v678_v12 = vmul.f32 1.442695, %v658_v10 }
 0x242   : > { %708 = vadd.xlane.f32.xlu1 %v1340_v11 }
 0x243   : > { %1130 = vpow2.f32 %v678_v12 }
 0x246   : > { %v633_v13 = vpop.xlane.xlu2 %632 }
 0x247   : > { %v659_v14 = vsub.f32 %v594_v47, %v633_v13 }
 0x249   : > { %v1343_v15 = vpop.eup %1130  ;;  %v680_v16 = vmul.f32 1.442695, %v659_v14 }
 0x24a   : > { %710 = vadd.xlane.f32.xlu2 %v1343_v15 }
 0x24b   : > { %1132 = vpow2.f32 %v680_v16 }
 0x24e   : > { %v635_v17 = vpop.xlane.xlu0 %634 }
 0x24f   : > { %v660_v18 = vsub.f32 %v597_v48, %v635_v17 }
 0x251   : > { %v1346_v19 = vpop.eup %1132  ;;  %v682_v20 = vmul.f32 1.442695, %v660_v18 }
 0x252   : > { %712 = vadd.xlane.f32.xlu0 %v1346_v19 }
 0x253   : > { %1134 = vpow2.f32 %v682_v20 }
 0x256   : > { %v637_v21 = vpop.xlane.xlu1 %636 }
 0x257   : > { %v661_v22 = vsub.f32 %v599_v49, %v637_v21 }
 0x259   : > { %v1349_v23 = vpop.eup %1134  ;;  %v684_v24 = vmul.f32 1.442695, %v661_v22 }
 0x25a   : > { %714 = vadd.xlane.f32.xlu1 %v1349_v23 }
 0x25b   : > { %1136 = vpow2.f32 %v684_v24 }
 0x25e   : > { %v639_v25 = vpop.xlane.xlu2 %638 }
 0x25f   : > { %v662_v26 = vsub.f32 %v1307_v50, %v639_v25 }
 0x261   : > { %v1353_v27 = vpop.eup %1136  ;;  %v686_v28 = vmul.f32 1.442695, %v662_v26 }
 0x262   : > { %716 = vadd.xlane.f32.xlu2 %v1353_v27 }
 0x263   : > { %1138 = vpow2.f32 %v686_v28 }
 0x266   : > { %v641_v29 = vpop.xlane.xlu0 %640 }
 0x267   : > { %v663_v30 = vsub.f32 %v1310_v51, %v641_v29 }
 0x269   : > { %v1357_v31 = vpop.eup %1138  ;;  %v688_v32 = vmul.f32 1.442695, %v663_v30 }
 0x26a   : > { %718 = vadd.xlane.f32.xlu0 %v1357_v31 }
 0x26b   : > { %1140 = vpow2.f32 %v688_v32 }
 0x26e   : > { %v643_v33 = vpop.xlane.xlu1 %642 }
 0x26f   : > { %v664_v34 = vsub.f32 %v1313_v52, %v643_v33 }
 0x271   : > { %v1361_v35 = vpop.eup %1140  ;;  %v690_v36 = vmul.f32 1.442695, %v664_v34 }
 0x272   : > { %720 = vadd.xlane.f32.xlu1 %v1361_v35 }
 0x273   : > { %1142 = vpow2.f32 %v690_v36 }
 0x276   : > { %v645_v37 = vpop.xlane.xlu2 %644 }
 0x277   : > { %v665_v38 = vsub.f32 %v1316_v53, %v645_v37 }
 0x279   : > { %v1365_v39 = vpop.eup %1142  ;;  %v692_v40 = vmul.f32 1.442695, %v665_v38 }
 0x27a   : > { %722 = vadd.xlane.f32.xlu2 %v1365_v39 }
 0x27b   : > { %1144 = vpow2.f32 %v692_v40 }
 0x281   : > { %v1368_v41 = vpop.eup %1144 }
 0x282   : > { %724 = vadd.xlane.f32.xlu0 %v1368_v41 }
 0x284   : > { %v647_v42 = vpop.xlane.xlu0 %646 }
 0x285   : > { %v666_v43 = vsub.f32 %v1319_v54, %v647_v42 }
 0x287   : > { %v694_v44 = vmul.f32 1.442695, %v666_v43 }
 0x289   : > { %1146 = vpow2.f32 %v694_v44 }
 0x28c   : > { %v649_v45 = vpop.xlane.xlu1 %648 }
 0x28d   : > { %v667_v46 = vsub.f32 %v1322_v55, %v649_v45 }
 0x28f   : > { %v1373_v47 = vpop.eup %1146  ;;  %v696_v48 = vmul.f32 1.442695, %v667_v46 }
 0x290   : > { %726 = vadd.xlane.f32.xlu1 %v1373_v47 }
 0x291   : > { %1148 = vpow2.f32 %v696_v48 }
 0x294   : > { %v651_v49 = vpop.xlane.xlu2 %650 }
 0x295   : > { %v668_v50 = vsub.f32 %v1325_v58, %v651_v49 }
 0x297   : > { %v1377_v51 = vpop.eup %1148  ;;  %v698_v52 = vmul.f32 1.442695, %v668_v50 }
 0x298   : > { %728 = vadd.xlane.f32.xlu2 %v1377_v51 }
 0x299   : > { %1150 = vpow2.f32 %v698_v52 }
 0x29c   : > { %v653_v53 = vpop.xlane.xlu0 %652 }
 0x29d   : > { %v669_v54 = vsub.f32 %v1328_v62, %v653_v53  ;;  %v703_v56 = vpop.xlane.xlu1 %702 }
 0x29e   : > { %1152 = vrcp.f32 %v703_v56 }
 0x29f   : > { %v1381_v55 = vpop.eup %1150  ;;  %v700_v57 = vmul.f32 1.442695, %v669_v54 }
 0x2a0   : > { %730 = vadd.xlane.f32.xlu0 %v1381_v55 }
 0x2a1   : > { %1154 = vpow2.f32 %v700_v57 }
 0x2a4   : > { %v1153_v59 = vpop.eup %1152 }
 0x2a5   : > { %v705_v60 = vpop.xlane.xlu2 %704  ;;  %v750_v61 = vmul.f32 %v1153_v59, %v703_v56 }
 0x2a6   : > { %1156 = vrcp.f32 %v705_v60 }
 0x2a7   : > { %v1384_v58 = vpop.eup %1154  ;;  %v766_v0 = vsub.f32 2.0, %v750_v61 }
 0x2a8   : > { %732 = vadd.xlane.f32.xlu1 %v1384_v58 }
 0x2a9   : > { %v782_v4 = vmul.f32 %v1153_v59, %v766_v0 }
 0x2ab   : > { %v798_v8 = vmul.f32 %v1330_v63, %v782_v4 }
 0x2ac   : > { %v1157_v1 = vpop.eup %1156 }
 0x2ad   : > { %v751_v62 = vmul.f32 %v1157_v1, %v705_v60  ;;  %v707_v2 = vpop.xlane.xlu0 %706 }
 0x2ae   : > { %1158 = vrcp.f32 %v707_v2 }
 0x2af   : > { %v767_v5 = vsub.f32 2.0, %v751_v62 }
 0x2b1   : > { %v783_v6 = vmul.f32 %v1157_v1, %v767_v5 }
 0x2b3   : > { %v799_v9 = vmul.f32 %v1334_v3, %v783_v6 }
 0x2b4   : > { %v1159_v10 = vpop.eup %1158 }
 0x2b5   : > { %v1054_v12 = vpack.c.bf16 %v799_v9, %v798_v8  ;;  %v709_v13 = vpop.xlane.xlu1 %708  ;;  %v752_v14 = vmul.f32 %v1159_v10, %v707_v2 }
 0x2b6   : > { %1160 = vrcp.f32 %v709_v13 }
 0x2b7   : > { %1055 = vst [vmem:[%s1394_s11] sm:$0xff] %v1054_v12   ;;  %v768_v16 = vsub.f32 2.0, %v752_v14 }
 0x2b9   : > { %v784_v3 = vmul.f32 %v1159_v10, %v768_v16 }
 0x2bb   : > { %v800_v22 = vmul.f32 %v1337_v7, %v784_v3 }
 0x2bc   : > { %v1161_v17 = vpop.eup %1160 }
 0x2bd   : > { %v753_v18 = vmul.f32 %v1161_v17, %v709_v13  ;;  %v711_v63 = vpop.xlane.xlu2 %710 }
 0x2be   : > { %1162 = vrcp.f32 %v711_v63 }
 0x2bf   : > { %v769_v20 = vsub.f32 2.0, %v753_v18 }
 0x2c1   : > { %v785_v21 = vmul.f32 %v1161_v17, %v769_v20 }
 0x2c3   : > { %v801_v24 = vmul.f32 %v1340_v11, %v785_v21 }
 0x2c4   : > { %v1163_v25 = vpop.eup %1162 }
 0x2c5   : > { %v1059_v26 = vpack.c.bf16 %v801_v24, %v800_v22  ;;  %v713_v28 = vpop.xlane.xlu0 %712  ;;  %v754_v29 = vmul.f32 %v1163_v25, %v711_v63 }
 0x2c6   : > { %1164 = vrcp.f32 %v713_v28 }
 0x2c7   : > { %1091 = vst [vmem:[%s1394_s11 + $0x8] sm:$0xff] %v1059_v26   ;;  %v770_v30 = vsub.f32 2.0, %v754_v29 }
 0x2c9   : > { %v786_v36 = vmul.f32 %v1163_v25, %v770_v30 }
 0x2cb   : > { %v802_v40 = vmul.f32 %v1343_v15, %v786_v36 }
 0x2cc   : > { %v1165_v32 = vpop.eup %1164 }
 0x2cd   : > { %v755_v33 = vmul.f32 %v1165_v32, %v713_v28  ;;  %v715_v34 = vpop.xlane.xlu1 %714 }
 0x2ce   : > { %1166 = vrcp.f32 %v715_v34 }
 0x2cf   : > { %v771_v37 = vsub.f32 2.0, %v755_v33 }
 0x2d1   : > { %v787_v38 = vmul.f32 %v1165_v32, %v771_v37 }
 0x2d3   : > { %v803_v7 = vmul.f32 %v1346_v19, %v787_v38 }
 0x2d4   : > { %v1167_v11 = vpop.eup %1166 }
 0x2d5   : > { %v1064_v42 = vpack.c.bf16 %v803_v7, %v802_v40  ;;  %v717_v43 = vpop.xlane.xlu2 %716  ;;  %v756_v44 = vmul.f32 %v1167_v11, %v715_v34 }
 0x2d6   : > { %1168 = vrcp.f32 %v717_v43 }
 0x2d7   : > { %1092 = vst [vmem:[%s1394_s11 + $0x10] sm:$0xff] %v1064_v42   ;;  %v772_v45 = vsub.f32 2.0, %v756_v44 }
 0x2d9   : > { %v788_v50 = vmul.f32 %v1167_v11, %v772_v45 }
 0x2db   : > { %v804_v54 = vmul.f32 %v1349_v23, %v788_v50 }
 0x2dc   : > { %v1169_v46 = vpop.eup %1168 }
 0x2dd   : > { %v757_v48 = vmul.f32 %v1169_v46, %v717_v43  ;;  %v719_v49 = vpop.xlane.xlu0 %718 }
 0x2de   : > { %1170 = vrcp.f32 %v719_v49 }
 0x2df   : > { %v773_v52 = vsub.f32 2.0, %v757_v48 }
 0x2e1   : > { %v789_v53 = vmul.f32 %v1169_v46, %v773_v52 }
 0x2e3   : > { %v805_v15 = vmul.f32 %v1353_v27, %v789_v53 }
 0x2e4   : > { %v1171_v19 = vpop.eup %1170 }
 0x2e5   : > { %v1069_v56 = vpack.c.bf16 %v805_v15, %v804_v54  ;;  %v721_v57 = vpop.xlane.xlu1 %720  ;;  %v758_v59 = vmul.f32 %v1171_v19, %v719_v49 }
 0x2e6   : > { %1172 = vrcp.f32 %v721_v57 }
 0x2e7   : > { %1093 = vst [vmem:[%s1394_s11 + $0x18] sm:$0xff] %v1069_v56   ;;  %v774_v60 = vsub.f32 2.0, %v758_v59 }
 0x2e9   : > { %v790_v62 = vmul.f32 %v1171_v19, %v774_v60 }
 0x2eb   : > { %v806_v5 = vmul.f32 %v1357_v31, %v790_v62 }
 0x2ec   : > { %v1173_v61 = vpop.eup %1172 }
 0x2ed   : > { %v759_v0 = vmul.f32 %v1173_v61, %v721_v57  ;;  %v723_v1 = vpop.xlane.xlu2 %722 }
 0x2ee   : > { %1174 = vrcp.f32 %v723_v1 }
 0x2ef   : > { %v775_v2 = vsub.f32 2.0, %v759_v0 }
 0x2f1   : > { %v791_v4 = vmul.f32 %v1173_v61, %v775_v2 }
 0x2f3   : > { %v807_v23 = vmul.f32 %v1361_v35, %v791_v4 }
 0x2f4   : > { %v1175_v27 = vpop.eup %1174 }
 0x2f5   : > { %v1074_v6 = vpack.c.bf16 %v807_v23, %v806_v5  ;;  %v725_v8 = vpop.xlane.xlu0 %724  ;;  %v760_v9 = vmul.f32 %v1175_v27, %v723_v1 }
 0x2f6   : > { %1176 = vrcp.f32 %v725_v8 }
 0x2f7   : > { %1094 = vst [vmem:[%s1394_s11 + $0x20] sm:$0xff] %v1074_v6   ;;  %v776_v10 = vsub.f32 2.0, %v760_v9 }
 0x2f9   : > { %v792_v14 = vmul.f32 %v1175_v27, %v776_v10 }
 0x2fb   : > { %v808_v18 = vmul.f32 %v1365_v39, %v792_v14 }
 0x2fc   : > { %v1177_v12 = vpop.eup %1176 }
 0x2fd   : > { %v761_v13 = vmul.f32 %v1177_v12, %v725_v8 }
 0x2ff   : > { %v777_v16 = vsub.f32 2.0, %v761_v13 }
 0x301   : > { %v793_v17 = vmul.f32 %v1177_v12, %v777_v16 }
 0x303   : > { %v809_v63 = vmul.f32 %v1368_v41, %v793_v17  ;;  %v727_v31 = vpop.xlane.xlu1 %726 }
 0x304   : > { %1178 = vrcp.f32 %v727_v31 }
 0x305   : > { %v1079_v35 = vpack.c.bf16 %v809_v63, %v808_v18 }
 0x307   : > { %1095 = vst [vmem:[%s1394_s11 + $0x28] sm:$0xff] %v1079_v35  }
 0x30a   : > { %v1179_v3 = vpop.eup %1178 }
 0x30b   : > { %v729_v20 = vpop.xlane.xlu2 %728  ;;  %v762_v21 = vmul.f32 %v1179_v3, %v727_v31 }
 0x30c   : > { %1180 = vrcp.f32 %v729_v20 }
 0x30d   : > { %v778_v22 = vsub.f32 2.0, %v762_v21 }
 0x30f   : > { %v794_v28 = vmul.f32 %v1179_v3, %v778_v22 }
 0x311   : > { %v810_v39 = vmul.f32 %v1373_v47, %v794_v28 }
 0x312   : > { %v1181_v24 = vpop.eup %1180 }
 0x313   : > { %v763_v25 = vmul.f32 %v1181_v24, %v729_v20  ;;  %v731_v26 = vpop.xlane.xlu0 %730 }
 0x314   : > { %1182 = vrcp.f32 %v731_v26 }
 0x315   : > { %v779_v29 = vsub.f32 2.0, %v763_v25 }
 0x317   : > { %v795_v30 = vmul.f32 %v1181_v24, %v779_v29 }
 0x319   : > { %v811_v41 = vmul.f32 %v1377_v51, %v795_v30 }
 0x31a   : > { %v1183_v32 = vpop.eup %1182 }
 0x31b   : > { %v1084_v33 = vpack.c.bf16 %v811_v41, %v810_v39  ;;  %v733_v34 = vpop.xlane.xlu1 %732  ;;  %v764_v36 = vmul.f32 %v1183_v32, %v731_v26 }
 0x31c   : > { %1184 = vrcp.f32 %v733_v34 }
 0x31d   : > { %1096 = vst [vmem:[%s1394_s11 + $0x30] sm:$0xff] %v1084_v33   ;;  %v780_v37 = vsub.f32 2.0, %v764_v36 }
 0x31f   : > { %v796_v7 = vmul.f32 %v1183_v32, %v780_v37 }
 0x321   : > { %v812_v43 = vmul.f32 %v1381_v55, %v796_v7 }
 0x322   : > { %v1185_v38 = vpop.eup %1184 }
 0x323   : > { %v765_v40 = vmul.f32 %v1185_v38, %v733_v34 }
 0x325   : > { %v781_v11 = vsub.f32 2.0, %v765_v40 }
 0x327   : > { %v797_v42 = vmul.f32 %v1185_v38, %v781_v11 }
 0x329   : > { %v813_v44 = vmul.f32 %v1384_v58, %v797_v42 }
 0x32b   : > { %v1089_v47 = vpack.c.bf16 %v813_v44, %v812_v43 }
 0x32d   : > { %1097 = vst [vmem:[%s1394_s11 + $0x38] sm:$0xff] %v1089_v47  }
 0x32e PF: > { %s14_s15 = sadd.s32 1, %s1192_s15  }
 0x32f   : > { %p11_p4 = scmp.ge.s32.totalorder %s14_s15, 4  }
 0x331   :  { %13 = sbr.rel (!%p11_p4) target bundleno = 1 (0x1), region = 66 }

</bundles_post_ra>
